<compile_context>
chip_gen: v6e
topology: v6e:2x2x1
jax: 0.10.0
libtpu: 0.0.40
codegen_flags: <defaults>
</compile_context>

<pallas_src>
import functools
import math

import jax
import jax.numpy as jnp
from jax.experimental import pallas as pl
from jax.experimental.pallas import tpu as pltpu

LANE = 128
SUBLANE = 8


def _round_up(x, m):
    return (x + m - 1) // m * m


def _cdiv(a, b):
    return -(-a // b)


def _pad2(a, rows, cols):
    r, c = a.shape
    return jnp.pad(a, ((0, rows - r), (0, cols - c)))


# ----------------------------------------------------------------------------
# Kernel
# ----------------------------------------------------------------------------
def qnet_kernel(x_ref, w1_ref, b1_ref, w2_ref, b2_ref, w3_ref, b3_ref, o_ref):
    # fc1 + ReLU (f32 accumulation on the MXU regardless of operand dtype).
    h1 = jnp.dot(x_ref[...], w1_ref[...],
                 preferred_element_type=jnp.float32) + b1_ref[...]
    h1 = jnp.maximum(h1, 0.0)
    # fc2 + ReLU
    h2 = jnp.dot(h1.astype(w2_ref.dtype), w2_ref[...],
                 preferred_element_type=jnp.float32) + b2_ref[...]
    h2 = jnp.maximum(h2, 0.0)
    # fc3 (no activation); store lane-dense in o_ref.dtype.
    o_ref[...] = (jnp.dot(h2.astype(w3_ref.dtype), w3_ref[...],
                          preferred_element_type=jnp.float32)
                  + b3_ref[...]).astype(o_ref.dtype)


# ----------------------------------------------------------------------------
# One-time parameter preparation (pad + cast OUTSIDE the per-call path)
# ----------------------------------------------------------------------------
def prepare_params(params, *, operand_dtype=jnp.bfloat16):
    """Pad weights/biases to hardware-friendly shapes and cast operands once.

    Zero padding is numerically inert: padded weight rows/cols and bias
    columns are 0, and padded x columns are 0.
    Returns (padded_params_dict, meta_dict).  Biases stay f32 (added to the
    f32 accumulator).
    """
    w1, b1, w2, b2, w3, b3 = (params["w1"], params["b1"], params["w2"],
                              params["b2"], params["w3"], params["b3"])
    S, H = w1.shape
    A = w3.shape[1]

    S_pad = _round_up(max(S, SUBLANE), SUBLANE)   # fc1 contraction dim
    H_pad = _round_up(H, LANE)                    # hidden lanes
    A_pad = _round_up(A, LANE)                    # output lanes (lane-dense)

    padded = {
        "w1": _pad2(w1, S_pad, H_pad).astype(operand_dtype),
        "b1": _pad2(b1, 1, H_pad).astype(jnp.float32),
        "w2": _pad2(w2, H_pad, H_pad).astype(operand_dtype),
        "b2": _pad2(b2, 1, H_pad).astype(jnp.float32),
        "w3": _pad2(w3, H_pad, A_pad).astype(operand_dtype),
        "b3": _pad2(b3, 1, A_pad).astype(jnp.float32),
    }
    meta = {"state_size": S, "hidden": H, "action_size": A}
    return padded, meta


# ----------------------------------------------------------------------------
# Forward wrapper
# ----------------------------------------------------------------------------
def qnetwork_forward(x, padded_params, *, action_size, batch_tile=2048,
                     min_grid=2, out_dtype=None):
    """x: (B, state_size) float32; padded_params from prepare_params().

    Returns (B, action_size) float32.
    """
    p = padded_params
    B, S = x.shape
    S_pad, H_pad = p["w1"].shape
    A_pad = p["w3"].shape[1]
    op_dtype = p["w1"].dtype
    if out_dtype is None:
        out_dtype = op_dtype            # bf16 output halves HBM writeback

    # --- batch tiling -------------------------------------------------------
    # Choose the number of tiles first, then tb = round_up(ceil(B/n), 8):
    # ragged batches overshoot by <= 7 rows per tile (no round_up(B, tb)).
    # min_grid=2 keeps >= 2 grid steps when B allows it so the "parallel"
    # axis can shard across both TensorCores on v7x.
    n_tiles = max(_cdiv(B, batch_tile), min_grid)
    n_tiles = min(n_tiles, max(1, _cdiv(B, SUBLANE)))   # tiles >= 8 rows
    tb = _round_up(_cdiv(B, n_tiles), SUBLANE)
    n_tiles = max(1, _cdiv(B, tb))
    B_pad = n_tiles * tb
    grid = (n_tiles,)

    # x padded to (B_pad, S_pad) and cast to the operand dtype.
    x_p = _pad2(x.astype(jnp.float32), B_pad, S_pad).astype(op_dtype)

    # Weights/biases: constant index_map -> same block every step, stays
    # VMEM-resident across the whole grid.
    resident = lambda shape: pl.BlockSpec(shape, lambda i: (0, 0))

    # --- cost estimate + VMEM budget ----------------------------------------
    op_isz = jnp.dtype(op_dtype).itemsize
    out_isz = jnp.dtype(out_dtype).itemsize
    flops = 2 * B_pad * (S_pad * H_pad + H_pad * H_pad + H_pad * A_pad)
    bytes_accessed = (op_isz * (x_p.size + p["w1"].size + p["w2"].size
                                + p["w3"].size)
                      + 4 * (p["b1"].size + p["b2"].size + p["b3"].size)
                      + out_isz * B_pad * A_pad)

    weight_bytes = (op_isz * (p["w1"].size + p["w2"].size + p["w3"].size)
                    + 4 * (p["b1"].size + p["b2"].size + p["b3"].size))
    # Double-buffered x/out tiles + (conservatively double-buffered) weights.
    vmem_est = (2 * tb * (S_pad * op_isz + A_pad * out_isz)
                + 2 * weight_bytes)

    compiler_kwargs = dict(dimension_semantics=("parallel",))  # v7x megacore
    if vmem_est > 12 * (1 << 20):
        # Only needed if someone pushes batch_tile far past the default;
        # 64 MiB is within physical VMEM on every generation (v7x min).
        compiler_kwargs["vmem_limit_bytes"] = int(
            min(2 * vmem_est + (4 << 20), 64 << 20))

    out_p = pl.pallas_call(
        qnet_kernel,
        out_shape=jax.ShapeDtypeStruct((B_pad, A_pad), out_dtype),
        grid=grid,
        in_specs=[
            pl.BlockSpec((tb, S_pad), lambda i: (i, 0)),   # x: tiled over batch
            resident(p["w1"].shape), resident(p["b1"].shape),
            resident(p["w2"].shape), resident(p["b2"].shape),
            resident(p["w3"].shape), resident(p["b3"].shape),
        ],
        out_specs=pl.BlockSpec((tb, A_pad), lambda i: (i, 0)),
        compiler_params=pltpu.CompilerParams(**compiler_kwargs),
        cost_estimate=pl.CostEstimate(flops=flops, transcendentals=0,
                                      bytes_accessed=bytes_accessed),
    )(x_p, p["w1"], p["b1"], p["w2"], p["b2"], p["w3"], p["b3"])

    return out_p[:B, :action_size].astype(jnp.float32)


# ----------------------------------------------------------------------------
# Init / reference (mirrors PyTorch nn.Linear default init & forward)
# ----------------------------------------------------------------------------
def init_params(key, state_size, action_size, hidden=64):
    """PyTorch nn.Linear default init: U(+/- 1/sqrt(fan_in)) for W and b."""
    keys = jax.random.split(key, 6)

    def linear(kw, kb, fan_in, fan_out):
        bound = 1.0 / math.sqrt(fan_in)
        w = jax.random.uniform(kw, (fan_in, fan_out), jnp.float32, -bound, bound)
        b = jax.random.uniform(kb, (1, fan_out), jnp.float32, -bound, bound)
        return w, b

    w1, b1 = linear(keys[0], keys[1], state_size, hidden)
    w2, b2 = linear(keys[2], keys[3], hidden, hidden)
    w3, b3 = linear(keys[4], keys[5], hidden, action_size)
    return {"w1": w1, "b1": b1, "w2": w2, "b2": b2, "w3": w3, "b3": b3}


def reference_forward(x, p):
    h1 = jnp.maximum(x @ p["w1"] + p["b1"], 0.0)
    h2 = jnp.maximum(h1 @ p["w2"] + p["b2"], 0.0)
    return h2 @ p["w3"] + p["b3"]


# ----------------------------------------------------------------------------
# Self-test
# ----------------------------------------------------------------------------
if __name__ == "__main__":
    key = jax.random.PRNGKey(0)
    k_param, k_x_small, k_x_big, k_x_rag = jax.random.split(key, 4)

    # CartPole-like: state_size=4, action_size=2, hidden=64.
    state_size, action_size = 4, 2
    params = init_params(k_param, state_size, action_size)

    # ---- Exact f32 path (small batch, single grid step) --------------------
    padded_f32, meta = prepare_params(params, operand_dtype=jnp.float32)
    fwd_f32 = jax.jit(functools.partial(
        qnetwork_forward, action_size=meta["action_size"]))
    x_small = jax.random.normal(k_x_small, (8, state_size), jnp.float32)
    out_small = jax.block_until_ready(fwd_f32(x_small, padded_f32))
    ref_small = reference_forward(x_small, params)
    assert out_small.shape == (8, action_size)
    assert jnp.allclose(out_small, ref_small, atol=1e-5, rtol=1e-5)

    # ---- Default bf16-operand path (grid >= 2, batch-tiled / megacore) -----
    padded_bf16, meta = prepare_params(params, operand_dtype=jnp.bfloat16)
    fwd_bf16 = jax.jit(functools.partial(
        qnetwork_forward, action_size=meta["action_size"]))
    x_big = jax.random.normal(k_x_big, (512, state_size), jnp.float32)
    out_big = jax.block_until_ready(fwd_bf16(x_big, padded_bf16))
    ref_big = reference_forward(x_big, params)
    assert out_big.shape == (512, action_size)
    assert jnp.allclose(out_big, ref_big, atol=2.5e-2, rtol=2.5e-2)

    # ---- Ragged batch (exercises the overshoot-limited tile choice) --------
    fwd_rag = jax.jit(functools.partial(
        qnetwork_forward, action_size=meta["action_size"], batch_tile=128))
    x_rag = jax.random.normal(k_x_rag, (300, state_size), jnp.float32)
    out_rag = jax.block_until_ready(fwd_rag(x_rag, padded_bf16))
    ref_rag = reference_forward(x_rag, params)
    assert out_rag.shape == (300, action_size)
    assert jnp.allclose(out_rag, ref_rag, atol=2.5e-2, rtol=2.5e-2)

    print("KERNEL_OK")
</pallas_src>

<mosaic_0001>
module attributes {stable_mosaic.version = 11 : i64} {
  func.func @qnet_kernel(%arg0: i32, %arg1: memref<8x8xf32, #tpu.memory_space<vmem>>, %arg2: memref<8x128xf32, #tpu.memory_space<vmem>>, %arg3: memref<1x128xf32, #tpu.memory_space<vmem>>, %arg4: memref<128x128xf32, #tpu.memory_space<vmem>>, %arg5: memref<1x128xf32, #tpu.memory_space<vmem>>, %arg6: memref<128x128xf32, #tpu.memory_space<vmem>>, %arg7: memref<1x128xf32, #tpu.memory_space<vmem>>, %arg8: memref<8x128xf32, #tpu.memory_space<vmem>>) attributes {dimension_semantics = [#tpu.dimension_semantics<parallel>], iteration_bounds = array<i64: 1>, scalar_prefetch = 0 : i64, scratch_operands = 0 : i64, tpu.core_type = #tpu.core_type<tc>, window_params = [{transform_indices = @transform_0, window_bounds = array<i64: 8, 8>}, {pipeline_mode = #tpu.pipeline_mode<synchronous>, transform_indices = @transform_1, window_bounds = array<i64: 8, 128>}, {pipeline_mode = #tpu.pipeline_mode<synchronous>, transform_indices = @transform_2, window_bounds = array<i64: 1, 128>}, {pipeline_mode = #tpu.pipeline_mode<synchronous>, transform_indices = @transform_3, window_bounds = array<i64: 128, 128>}, {pipeline_mode = #tpu.pipeline_mode<synchronous>, transform_indices = @transform_4, window_bounds = array<i64: 1, 128>}, {pipeline_mode = #tpu.pipeline_mode<synchronous>, transform_indices = @transform_5, window_bounds = array<i64: 128, 128>}, {pipeline_mode = #tpu.pipeline_mode<synchronous>, transform_indices = @transform_6, window_bounds = array<i64: 1, 128>}, {transform_indices = @transform_7, window_bounds = array<i64: 8, 128>}]} {
    %c0 = arith.constant 0 : index
    %c0_0 = arith.constant 0 : index
    %0 = vector.load %arg1[%c0, %c0_0] : memref<8x8xf32, #tpu.memory_space<vmem>>, vector<8x8xf32>
    %c0_1 = arith.constant 0 : index
    %c0_2 = arith.constant 0 : index
    %1 = vector.load %arg2[%c0_1, %c0_2] : memref<8x128xf32, #tpu.memory_space<vmem>>, vector<8x128xf32>
    %cst = arith.constant dense<0.000000e+00> : vector<8x128xf32>
    %2 = tpu.matmul %0, %1, %cst {dimension_numbers = #tpu.dot_dimension_numbers<[1], [0], [0], [1], [0, 0, 1, 1], [], []>} : vector<8x8xf32>, vector<8x128xf32>, vector<8x128xf32> -> vector<8x128xf32>
    %c0_3 = arith.constant 0 : index
    %c0_4 = arith.constant 0 : index
    %3 = vector.load %arg3[%c0_3, %c0_4] : memref<1x128xf32, #tpu.memory_space<vmem>>, vector<1x128xf32>
    %4 = vector.broadcast %3 : vector<1x128xf32> to vector<8x128xf32>
    %5 = arith.addf %2, %4 : vector<8x128xf32>
    %cst_5 = arith.constant 0.000000e+00 : f32
    %6 = vector.broadcast %cst_5 : f32 to vector<8x128xf32>
    %7 = arith.maximumf %5, %6 : vector<8x128xf32>
    %c0_6 = arith.constant 0 : index
    %c0_7 = arith.constant 0 : index
    %8 = vector.load %arg4[%c0_6, %c0_7] : memref<128x128xf32, #tpu.memory_space<vmem>>, vector<128x128xf32>
    %cst_8 = arith.constant dense<0.000000e+00> : vector<8x128xf32>
    %9 = tpu.matmul %7, %8, %cst_8 {dimension_numbers = #tpu.dot_dimension_numbers<[1], [0], [0], [1], [0, 0, 1, 1], [], []>} : vector<8x128xf32>, vector<128x128xf32>, vector<8x128xf32> -> vector<8x128xf32>
    %c0_9 = arith.constant 0 : index
    %c0_10 = arith.constant 0 : index
    %10 = vector.load %arg5[%c0_9, %c0_10] : memref<1x128xf32, #tpu.memory_space<vmem>>, vector<1x128xf32>
    %11 = vector.broadcast %10 : vector<1x128xf32> to vector<8x128xf32>
    %12 = arith.addf %9, %11 : vector<8x128xf32>
    %cst_11 = arith.constant 0.000000e+00 : f32
    %13 = vector.broadcast %cst_11 : f32 to vector<8x128xf32>
    %14 = arith.maximumf %12, %13 : vector<8x128xf32>
    %c0_12 = arith.constant 0 : index
    %c0_13 = arith.constant 0 : index
    %15 = vector.load %arg6[%c0_12, %c0_13] : memref<128x128xf32, #tpu.memory_space<vmem>>, vector<128x128xf32>
    %cst_14 = arith.constant dense<0.000000e+00> : vector<8x128xf32>
    %16 = tpu.matmul %14, %15, %cst_14 {dimension_numbers = #tpu.dot_dimension_numbers<[1], [0], [0], [1], [0, 0, 1, 1], [], []>} : vector<8x128xf32>, vector<128x128xf32>, vector<8x128xf32> -> vector<8x128xf32>
    %c0_15 = arith.constant 0 : index
    %c0_16 = arith.constant 0 : index
    %17 = vector.load %arg7[%c0_15, %c0_16] : memref<1x128xf32, #tpu.memory_space<vmem>>, vector<1x128xf32>
    %18 = vector.broadcast %17 : vector<1x128xf32> to vector<8x128xf32>
    %19 = arith.addf %16, %18 : vector<8x128xf32>
    %c0_17 = arith.constant 0 : index
    %c0_18 = arith.constant 0 : index
    %20 = vector.load %arg8[%c0_17, %c0_18] : memref<8x128xf32, #tpu.memory_space<vmem>>, vector<8x128xf32>
    tpu.vector_store %arg8[%c0_17, %c0_18], %19 {strides = array<i32>} : memref<8x128xf32, #tpu.memory_space<vmem>>, vector<8x128xf32>,
    return
  }
  func.func @transform_0(%arg0: i32) -> (i32, i32) {
    %c0_i32 = arith.constant 0 : i32
    %c0_i32_0 = arith.constant 0 : i32
    return %arg0, %c0_i32 : i32, i32
  }
  func.func @transform_1(%arg0: i32) -> (i32, i32) {
    %c0_i32 = arith.constant 0 : i32
    %c0_i32_0 = arith.constant 0 : i32
    %c0_i32_1 = arith.constant 0 : i32
    return %c0_i32, %c0_i32_0 : i32, i32
  }
  func.func @transform_2(%arg0: i32) -> (i32, i32) {
    %c0_i32 = arith.constant 0 : i32
    %c0_i32_0 = arith.constant 0 : i32
    %c0_i32_1 = arith.constant 0 : i32
    return %c0_i32, %c0_i32_0 : i32, i32
  }
  func.func @transform_3(%arg0: i32) -> (i32, i32) {
    %c0_i32 = arith.constant 0 : i32
    %c0_i32_0 = arith.constant 0 : i32
    %c0_i32_1 = arith.constant 0 : i32
    return %c0_i32, %c0_i32_0 : i32, i32
  }
  func.func @transform_4(%arg0: i32) -> (i32, i32) {
    %c0_i32 = arith.constant 0 : i32
    %c0_i32_0 = arith.constant 0 : i32
    %c0_i32_1 = arith.constant 0 : i32
    return %c0_i32, %c0_i32_0 : i32, i32
  }
  func.func @transform_5(%arg0: i32) -> (i32, i32) {
    %c0_i32 = arith.constant 0 : i32
    %c0_i32_0 = arith.constant 0 : i32
    %c0_i32_1 = arith.constant 0 : i32
    return %c0_i32, %c0_i32_0 : i32, i32
  }
  func.func @transform_6(%arg0: i32) -> (i32, i32) {
    %c0_i32 = arith.constant 0 : i32
    %c0_i32_0 = arith.constant 0 : i32
    %c0_i32_1 = arith.constant 0 : i32
    return %c0_i32, %c0_i32_0 : i32, i32
  }
  func.func @transform_7(%arg0: i32) -> (i32, i32) {
    %c0_i32 = arith.constant 0 : i32
    %c0_i32_0 = arith.constant 0 : i32
    return %arg0, %c0_i32 : i32, i32
  }
}

</mosaic_0001>

<bundles_post_ra>
// kernel: qnetwork_forward.1
= control target key start
LH: loop header
LB: loop body
LE: loop exit
PB: predicated region body
PF: predicated region fallthrough
CT: control target
= control target key end

     0   :  { %12 = vsyncpa [#allocation3], 0  ;;  %s606_s0 = inlined_call_operand.vmem [shape: f32[8,8], index: 0, kind: input, shape index: {}]   ;;  %s607_s1 = inlined_call_operand.vmem [shape: f32[8,128], index: 1, kind: input, shape index: {}]   ;;  %s608_s2 = inlined_call_operand.vmem [shape: f32[1,128], index: 2, kind: input, shape index: {}]   ;;  %s609_s3 = inlined_call_operand.hbm [shape: f32[128,128], index: 3, kind: input, shape index: {}]   ;;  %s610_s4 = inlined_call_operand.vmem [shape: f32[1,128], index: 4, kind: input, shape index: {}]   ;;  %s611_s5 = inlined_call_operand.hbm [shape: f32[128,128], index: 5, kind: input, shape index: {}]   ;;  %s612_s6 = inlined_call_operand.vmem [shape: f32[1,128], index: 6, kind: input, shape index: {}]   ;;  %s613_s7 = inlined_call_operand.vmem [shape: f32[8,128], index: 7, kind: output, shape index: {}]  }
   0x1   :  { %13 = vsyncpa [#allocation5], 0  ;;  %s497_s24 = smov [#allocation2]  }
   0x2   :  { %s25_s25 = sshll.u32 %s497_s24, 4  ;;  %s26_s25 = int_to_ptr.vmem [resolvable:$true] %s25_s25 }
   0x3   :  { %s461_s26 = scalar_lea.vmem %s26_s25, 2048  ;;  %p466_p1 = scmp.lt.s32.totalorder %s26_s25, %s26_s25 }
   0x4   :  { %p462_p0 = scmp.ne.s32.totalorder %s26_s25, %s461_s26  ;;  %p467_p2 = scmp.lt.s32.totalorder %s461_s26, %s461_s26 }
   0x6   :  { %p468_p3 = por %p467_p2, %p466_p1 }
   0x8   :  { %p469_p4 = pnand %p468_p3, %p462_p0 }
   0xa   :  { %472 = shalt.err (!%p469_p4)
}
   0xb   :  { %s498_s27 = smov 128   ;;  %s499_s28 = smov 8  }
   0xc   :  { %31 = dma.hbm_to_vmem [thread:$0]  %s609_s3, 2048, %s26_s25, [#allocation3], %s498_s27, %s498_s27, %s499_s28  }
   0xd   :  { %s500_s8 = smov [#allocation4]  }
   0xe   :  { %s39_s9 = sshll.u32 %s500_s8, 4  ;;  %s40_s9 = int_to_ptr.vmem [resolvable:$true] %s39_s9 }
   0xf   :  { %s481_s10 = scalar_lea.vmem %s40_s9, 2048  ;;  %p486_p6 = scmp.lt.s32.totalorder %s40_s9, %s40_s9 }
  0x10   :  { %p482_p5 = scmp.ne.s32.totalorder %s40_s9, %s481_s10  ;;  %p487_p7 = scmp.lt.s32.totalorder %s481_s10, %s481_s10 }
  0x12   :  { %p488_p8 = por %p487_p7, %p486_p6 }
  0x14   :  { %p489_p9 = pnand %p488_p8, %p482_p5 }
  0x16   :  { %492 = shalt.err (!%p489_p9)
}
  0x17   :  { %45 = dma.hbm_to_vmem [thread:$0]  %s611_s5, 2048, %s40_s9, [#allocation5], %s498_s27, %s498_s27, %s499_s28  }
  0x18   :  { %493 = dma.done.wait [#allocation3], 2048  }
  0x19   :  { %494 = vsyncadd [#allocation3], 4294965248 }
  0x1a   :  { %495 = dma.done.wait [#allocation5], 2048  }
  0x1b   :  { %496 = vsyncadd [#allocation5], 4294965248  ;;  %v501_v0 = vmov 0.0   ;;  %vm502_vm0 = vmmov 0   ;;  %vm63_vm1 = vcmask 64512   ;;  %v55_v1 = vld [vmem:[%s607_s1] sm:$0xff] }
  0x1c   :  { %372 = vmatprep.subr.mxu0 %v501_v0  ;;  %374 = vmatprep.mubr.msk.f32.mxu0 %vm502_vm0, %v501_v0  ;;  %v54_v2 = vld [vmem:[%s606_s0] sm:$0xff]  ;;  %v153_v3 = vld [vmem:[#allocation2 + $0x78] sm:$0xff]  ;;  %v152_v4 = vld [vmem:[#allocation2 + $0x70] sm:$0xff] }
  0x1d   :  { %377 = vmatprep.subr.mxu1 %v501_v0  ;;  %409 = vmatprep.mubr.msk.f32.mxu1 %vm502_vm0, %v501_v0  ;;  %v151_v5 = vld [vmem:[#allocation2 + $0x68] sm:$0xff]  ;;  %v150_v6 = vld [vmem:[#allocation2 + $0x60] sm:$0xff]  ;;  %v149_v7 = vld [vmem:[#allocation2 + $0x58] sm:$0xff] }
  0x1e   :  { %373 = vmatpush3.msra.mxu0 %v55_v1  ;;  %378 = vmatpush3.msra.mxu1 %v153_v3  ;;  %v148_v8 = vld [vmem:[#allocation2 + $0x50] sm:$0xff]  ;;  %v147_v9 = vld [vmem:[#allocation2 + $0x48] sm:$0xff]  ;;  %v146_v10 = vld [vmem:[#allocation2 + $0x40] sm:$0xff] }
  0x1f   :  { %375 = vmatmul.mubr.msk.f32.vlgmr.msra.gmra.mxu0 %vm63_vm1, %v54_v2  ;;  %379 = vmatprep.subr.mxu1 %v501_v0  ;;  %v145_v11 = vld [vmem:[#allocation2 + $0x38] sm:$0xff]  ;;  %v144_v12 = vld [vmem:[#allocation2 + $0x30] sm:$0xff]  ;;  %v143_v13 = vld [vmem:[#allocation2 + $0x28] sm:$0xff] }
  0x20   :  { %380 = vmatpush3.msra.mxu1 %v152_v4  ;;  %412 = vmatprep.subr.mxu0 %v501_v0  ;;  %v142_v14 = vld [vmem:[#allocation2 + $0x20] sm:$0xff]  ;;  %v141_v15 = vld [vmem:[#allocation2 + $0x18] sm:$0xff]  ;;  %v140_v16 = vld [vmem:[#allocation2 + $0x10] sm:$0xff] }
  0x21   :  { %381 = vmatprep.subr.mxu1 %v501_v0  ;;  %444 = vmatprep.mubr.msk.f32.mxu0 %vm502_vm0, %v501_v0  ;;  %v139_v17 = vld [vmem:[#allocation2 + $0x8] sm:$0xff]  ;;  %v138_v18 = vld [vmem:[#allocation2] sm:$0xff]  ;;  %v247_v19 = vld [vmem:[#allocation4 + $0x78] sm:$0xff] }
  0x22   :  { %382 = vmatpush3.msra.mxu1 %v151_v5  ;;  %v246_v20 = vld [vmem:[#allocation4 + $0x70] sm:$0xff]  ;;  %413 = vmatpush3.msra.mxu0 %v247_v19  ;;  %v245_v21 = vld [vmem:[#allocation4 + $0x68] sm:$0xff]  ;;  %v244_v22 = vld [vmem:[#allocation4 + $0x60] sm:$0xff] }
  0x23   :  { %383 = vmatprep.subr.mxu1 %v501_v0  ;;  %414 = vmatprep.subr.mxu0 %v501_v0  ;;  %v243_v23 = vld [vmem:[#allocation4 + $0x58] sm:$0xff]  ;;  %v242_v24 = vld [vmem:[#allocation4 + $0x50] sm:$0xff]  ;;  %v241_v25 = vld [vmem:[#allocation4 + $0x48] sm:$0xff] }
  0x24   :  { %384 = vmatpush3.msra.mxu1 %v150_v6  ;;  %415 = vmatpush3.msra.mxu0 %v246_v20  ;;  %v240_v26 = vld [vmem:[#allocation4 + $0x40] sm:$0xff]  ;;  %v239_v27 = vld [vmem:[#allocation4 + $0x38] sm:$0xff]  ;;  %v238_v28 = vld [vmem:[#allocation4 + $0x30] sm:$0xff] }
  0x25   :  { %385 = vmatprep.subr.mxu1 %v501_v0  ;;  %416 = vmatprep.subr.mxu0 %v501_v0  ;;  %v237_v29 = vld [vmem:[#allocation4 + $0x28] sm:$0xff]  ;;  %v236_v30 = vld [vmem:[#allocation4 + $0x20] sm:$0xff]  ;;  %v235_v31 = vld [vmem:[#allocation4 + $0x18] sm:$0xff] }
  0x26   :  { %386 = vmatpush3.msra.mxu1 %v149_v7  ;;  %417 = vmatpush3.msra.mxu0 %v245_v21  ;;  %v332_v32 = vld [vmem:[%s608_s2] ss:$0 sm:$0xff]  ;;  %v234_v37 = vld [vmem:[#allocation4 + $0x10] sm:$0xff]  ;;  %v233_v38 = vld [vmem:[#allocation4 + $0x8] sm:$0xff] }
  0x27   :  { %387 = vmatprep.subr.mxu1 %v501_v0  ;;  %418 = vmatprep.subr.mxu0 %v501_v0  ;;  %v232_v39 = vld [vmem:[#allocation4] sm:$0xff] }
  0x28   :  { %388 = vmatpush3.msra.mxu1 %v148_v8  ;;  %419 = vmatpush3.msra.mxu0 %v244_v22  ;;  %v334_v40 = vld [vmem:[%s610_s4] ss:$0 sm:$0xff] }
  0x29   :  { %389 = vmatprep.subr.mxu1 %v501_v0  ;;  %420 = vmatprep.subr.mxu0 %v501_v0  ;;  %v335_v45 = vld [vmem:[%s612_s6] ss:$0 sm:$0xff] }
  0x2a   :  { %390 = vmatpush3.msra.mxu1 %v147_v9  ;;  %421 = vmatpush3.msra.mxu0 %v243_v23 }
  0x2b   :  { %391 = vmatprep.subr.mxu1 %v501_v0  ;;  %422 = vmatprep.subr.mxu0 %v501_v0 }
  0x2c   :  { %392 = vmatpush3.msra.mxu1 %v146_v10  ;;  %423 = vmatpush3.msra.mxu0 %v242_v24 }
  0x2d   :  { %393 = vmatprep.subr.mxu1 %v501_v0  ;;  %424 = vmatprep.subr.mxu0 %v501_v0 }
  0x2e   :  { %394 = vmatpush3.msra.mxu1 %v145_v11  ;;  %425 = vmatpush3.msra.mxu0 %v241_v25 }
  0x2f   :  { %395 = vmatprep.subr.mxu1 %v501_v0  ;;  %426 = vmatprep.subr.mxu0 %v501_v0 }
  0x30   :  { %396 = vmatpush3.msra.mxu1 %v144_v12  ;;  %427 = vmatpush3.msra.mxu0 %v240_v26 }
  0x31   :  { %397 = vmatprep.subr.mxu1 %v501_v0  ;;  %428 = vmatprep.subr.mxu0 %v501_v0 }
  0x32   :  { %398 = vmatpush3.msra.mxu1 %v143_v13  ;;  %429 = vmatpush3.msra.mxu0 %v239_v27 }
  0x33   :  { %399 = vmatprep.subr.mxu1 %v501_v0  ;;  %430 = vmatprep.subr.mxu0 %v501_v0 }
  0x34   :  { %400 = vmatpush3.msra.mxu1 %v142_v14  ;;  %431 = vmatpush3.msra.mxu0 %v238_v28 }
  0x35   :  { %401 = vmatprep.subr.mxu1 %v501_v0  ;;  %432 = vmatprep.subr.mxu0 %v501_v0 }
  0x36   :  { %402 = vmatpush3.msra.mxu1 %v141_v15  ;;  %433 = vmatpush3.msra.mxu0 %v237_v29 }
  0x37   :  { %403 = vmatprep.subr.mxu1 %v501_v0  ;;  %434 = vmatprep.subr.mxu0 %v501_v0 }
  0x38   :  { %404 = vmatpush3.msra.mxu1 %v140_v16  ;;  %435 = vmatpush3.msra.mxu0 %v236_v30 }
  0x39   :  { %405 = vmatprep.subr.mxu1 %v501_v0  ;;  %436 = vmatprep.subr.mxu0 %v501_v0 }
  0x3a   :  { %406 = vmatpush3.msra.mxu1 %v139_v17  ;;  %437 = vmatpush3.msra.mxu0 %v235_v31 }
  0x3b   :  { %407 = vmatprep.subr.mxu1 %v501_v0  ;;  %438 = vmatprep.subr.mxu0 %v501_v0 }
  0x3c   :  { %408 = vmatpush3.msra.mxu1 %v138_v18  ;;  %439 = vmatpush3.msra.mxu0 %v234_v37 }
  0x3d   :  { %440 = vmatprep.subr.mxu0 %v501_v0 }
  0x3e   :  { %441 = vmatpush3.msra.mxu0 %v233_v38 }
  0x3f   :  { %442 = vmatprep.subr.mxu0 %v501_v0 }
  0x40   :  { %443 = vmatpush3.msra.mxu0 %v232_v39 }
  0xdf   :  { %v133_v33 = vpop.f32.mrf.mxu0 }
  0xe0   :  { %v134_v34 = vadd.f32 %v332_v32, %v133_v33 }
  0xe1   :  { %v376_v35 = vpop.f32.mrf.mxu0 }
  0xe2   :  { %v137_v36 = vmax.f32 %v134_v34, 0.0 }
  0xe4   :  { %410 = vmatmul.mubr.f32.vlgmr.msra.gmra.mxu1 %v137_v36 }
 0x1a4   :  { %v227_v41 = vpop.f32.mrf.mxu1 }
 0x1a5   :  { %v228_v42 = vadd.f32 %v334_v40, %v227_v41 }
 0x1a6   :  { %v411_v43 = vpop.f32.mrf.mxu1 }
 0x1a7   :  { %v231_v44 = vmax.f32 %v228_v42, 0.0 }
 0x1a9   :  { %445 = vmatmul.mubr.f32.vlgmr.msra.gmra.mxu0 %v231_v44 }
 0x269   :  { %v321_v46 = vpop.f32.mrf.mxu0 }
 0x26a   :  { %v322_v47 = vadd.f32 %v335_v45, %v321_v46 }
 0x26b   :  { %v446_v48 = vpop.f32.mrf.mxu0 }
 0x26c   :  { %325 = vst [vmem:[%s613_s7] sm:$0xff] %v322_v47 }
 0x26d   :  { %330 = vsyncpa [#allocation3], 1 }
 0x26e   :  { %331 = vsyncpa [#allocation5], 1 }

</bundles_post_ra>
